<compile_context>
chip_gen: v6e
topology: v6e:2x2x1
jax: 0.10.0
libtpu: 0.0.40
codegen_flags: <defaults>
</compile_context>

<pallas_src>
import functools

import jax
import jax.numpy as jnp
from jax.experimental import pallas as pl
from jax.experimental.pallas import tpu as pltpu


def _round_up(x, m):
    return (x + m - 1) // m * m


# --------------------------------------------------------------------------
# Pass 1: fused Q/K/V projection.  x tile arrives channels-first (C, t); the
# transpose is folded into the dot_general contraction, outputs are written
# channels-last (t, Cout) so the attention pass is fully lane-dense.
# --------------------------------------------------------------------------
def _proj_kernel(x_ref, wqkv_ref, bqkv_ref, q_ref, k_ref, v_ref, *, cqp):
    x = x_ref[0].astype(jnp.bfloat16)                               # (C, t)
    qkv = jax.lax.dot_general(
        x, wqkv_ref[...], (((0,), (0,)), ((), ())),
        preferred_element_type=jnp.float32) + bqkv_ref[...]         # (t, 2Cqp+Cp)
    q_ref[0] = qkv[:, :cqp].astype(jnp.bfloat16)
    k_ref[0] = qkv[:, cqp:2 * cqp].astype(jnp.bfloat16)
    v_ref[0] = qkv[:, 2 * cqp:].astype(jnp.bfloat16)


# --------------------------------------------------------------------------
# Pass 2: flash-style attention with online softmax + gamma*o + x epilogue.
# Output is written back in (C, t) channels-first layout so the wrapper only
# needs a reshape (no HBM transpose round trip).
# --------------------------------------------------------------------------
def _attn_kernel(q_ref, k_ref, v_ref, x_ref, gamma_ref, out_ref,
                 m_sc, l_sc, acc_sc, *, c, tk, n_real):
    ki = pl.program_id(2)
    nk = pl.num_programs(2)

    @pl.when(ki == 0)
    def _init():
        m_sc[...] = jnp.full_like(m_sc, -jnp.inf)
        l_sc[...] = jnp.zeros_like(l_sc)
        acc_sc[...] = jnp.zeros_like(acc_sc)

    q = q_ref[0]                                                    # (tq, Cqp) bf16
    k = k_ref[0]                                                    # (tk, Cqp) bf16
    v = v_ref[0]                                                    # (tk, Cp)  bf16

    # energy[i, j] = <q_i, k_j>; transpose folded into dot_general.
    energy = jax.lax.dot_general(
        q, k, (((1,), (1,)), ((), ())),
        preferred_element_type=jnp.float32)                         # (tq, tk)

    if n_real is not None:
        # N was padded up to a tile multiple: mask padded kv rows (their k
        # equals bk, nonzero, so they must not leak into the softmax).
        col = jax.lax.broadcasted_iota(jnp.int32, energy.shape, 1) + ki * tk
        energy = jnp.where(col < n_real, energy, -jnp.inf)

    # --- online softmax update ---
    m_prev = m_sc[...]
    m_new = jnp.maximum(m_prev, jnp.max(energy, axis=-1, keepdims=True))
    alpha = jnp.exp(m_prev - m_new)
    p = jnp.exp(energy - m_new)
    l_sc[...] = alpha * l_sc[...] + jnp.sum(p, axis=-1, keepdims=True)
    acc_sc[...] = alpha * acc_sc[...] + jnp.dot(
        p.astype(jnp.bfloat16), v, preferred_element_type=jnp.float32)
    m_sc[...] = m_new

    # --- finalize: normalize, transpose to channels-first, gamma + residual ---
    @pl.when(ki == nk - 1)
    def _fin():
        gamma = gamma_ref[0, 0]
        o = acc_sc[...] * pl.reciprocal(l_sc[...], approx=True)     # (tq, Cp)
        o_t = jnp.transpose(o)[:c, :]                               # (C, tq)
        out_ref[0] = (gamma * o_t + x_ref[0].astype(jnp.float32)
                      ).astype(out_ref.dtype)


def self_attn_forward(x_nchw, wq, bq, wk, bk, wv, bv, gamma):
    """x_nchw: (B, C, W, H) float32.  Weights use (C_in, C_out) layout
    (torch conv1x1 weight transposed).  Returns (B, C, W, H)."""
    B, C, W, H = x_nchw.shape
    N = W * H
    Cq = wq.shape[1]

    Cp = _round_up(C, 128)                 # lane-dense value channels
    Cqp = _round_up(max(Cq, 1), 128)       # full MXU tiles for q/k head dim

    # Tile size for both q and kv axes (multiple of 128); pad N up to it.
    t = min(256, _round_up(N, 128))
    npad = _round_up(N, t)
    nt = npad // t

    f32, bf16 = jnp.float32, jnp.bfloat16

    # Native (B, C, N) layout — a free reshape of NCHW (no HBM round trip).
    x_bcn = x_nchw.reshape(B, C, N)
    if npad != N:
        x_bcn = jnp.pad(x_bcn, ((0, 0), (0, 0), (0, npad - N)))

    # Fused, zero-padded [Wq | Wk | Wv] weights/biases (tiny; built once).
    # Padded q/k columns are zero in both q and k so they add nothing to the
    # energy; padded v columns stay zero.
    wq_p = jnp.pad(wq, ((0, 0), (0, Cqp - Cq)))
    wk_p = jnp.pad(wk, ((0, 0), (0, Cqp - Cq)))
    wv_p = jnp.pad(wv, ((0, 0), (0, Cp - C)))
    wqkv = jnp.concatenate([wq_p, wk_p, wv_p], axis=1).astype(bf16)  # (C, 2Cqp+Cp)
    bqkv = jnp.concatenate([jnp.pad(bq, (0, Cqp - Cq)),
                            jnp.pad(bk, (0, Cqp - Cq)),
                            jnp.pad(bv, (0, Cp - C))]
                           ).reshape(1, 2 * Cqp + Cp).astype(f32)

    # ---------------- Pass 1: projection (hoisted out of the flash loop) ----
    proj = functools.partial(_proj_kernel, cqp=Cqp)
    q_all, k_all, v_all = pl.pallas_call(
        proj,
        out_shape=(jax.ShapeDtypeStruct((B, npad, Cqp), bf16),
                   jax.ShapeDtypeStruct((B, npad, Cqp), bf16),
                   jax.ShapeDtypeStruct((B, npad, Cp), bf16)),
        grid_spec=pltpu.PrefetchScalarGridSpec(
            num_scalar_prefetch=0,
            grid=(B, nt),
            in_specs=[
                pl.BlockSpec((1, C, t), lambda b, ni: (b, 0, ni)),        # x
                pl.BlockSpec((C, 2 * Cqp + Cp), lambda b, ni: (0, 0)),    # [Wq|Wk|Wv]
                pl.BlockSpec((1, 2 * Cqp + Cp), lambda b, ni: (0, 0)),    # biases
            ],
            out_specs=(pl.BlockSpec((1, t, Cqp), lambda b, ni: (b, ni, 0)),
                       pl.BlockSpec((1, t, Cqp), lambda b, ni: (b, ni, 0)),
                       pl.BlockSpec((1, t, Cp), lambda b, ni: (b, ni, 0))),
        ),
        compiler_params=pltpu.CompilerParams(
            dimension_semantics=("parallel", "parallel"),
            vmem_limit_bytes=32 * 1024 * 1024),
    )(x_bcn, wqkv, bqkv)

    # ---------------- Pass 2: flash attention + epilogue ----------------
    gamma2 = gamma.reshape(1, 1).astype(f32)
    attn = functools.partial(_attn_kernel, c=C, tk=t,
                             n_real=None if npad == N else N)

    out_bcn = pl.pallas_call(
        attn,
        out_shape=jax.ShapeDtypeStruct((B, C, npad), x_nchw.dtype),
        grid_spec=pltpu.PrefetchScalarGridSpec(
            num_scalar_prefetch=0,
            grid=(B, nt, nt),
            in_specs=[
                pl.BlockSpec((1, t, Cqp), lambda b, qi, ki: (b, qi, 0)),  # Q
                pl.BlockSpec((1, t, Cqp), lambda b, qi, ki: (b, ki, 0)),  # K
                pl.BlockSpec((1, t, Cp), lambda b, qi, ki: (b, ki, 0)),   # V
                pl.BlockSpec((1, C, t), lambda b, qi, ki: (b, 0, qi)),    # x (residual)
                pl.BlockSpec(memory_space=pltpu.MemorySpace.SMEM),        # gamma
            ],
            out_specs=pl.BlockSpec((1, C, t), lambda b, qi, ki: (b, 0, qi)),
            scratch_shapes=[
                pltpu.VMEM((t, 1), f32),      # running max m
                pltpu.VMEM((t, 1), f32),      # running denom l
                pltpu.VMEM((t, Cp), f32),     # output accumulator
            ],
        ),
        compiler_params=pltpu.CompilerParams(
            dimension_semantics=("parallel", "parallel", "arbitrary"),
            vmem_limit_bytes=32 * 1024 * 1024),
    )(q_all, k_all, v_all, x_bcn, gamma2)

    if npad != N:
        out_bcn = out_bcn[:, :, :N]
    return out_bcn.reshape(B, C, W, H)


def _reference(x_nchw, wq, bq, wk, bk, wv, bv, gamma):
    """Plain-JAX f32 reference mirroring the PyTorch forward."""
    B, C, W, H = x_nchw.shape
    N = W * H
    xf = x_nchw.reshape(B, C, N)                                   # (B, C, N)
    q = jnp.einsum('bcn,cd->bdn', xf, wq) + bq[None, :, None]      # (B, Cq, N)
    k = jnp.einsum('bcn,cd->bdn', xf, wk) + bk[None, :, None]      # (B, Cq, N)
    v = jnp.einsum('bcn,cd->bdn', xf, wv) + bv[None, :, None]      # (B, C, N)
    energy = jnp.einsum('bdn,bdm->bnm', q, k)                      # (B, N, N)
    attn = jax.nn.softmax(energy, axis=-1)
    out = jnp.einsum('bcn,bmn->bcm', v, attn)                      # (B, C, N)
    out = gamma[0] * out + xf
    return out.reshape(B, C, W, H)


if __name__ == "__main__":
    key = jax.random.PRNGKey(0)
    B, C, W, H = 2, 64, 16, 16        # N = 256 -> one 256-row tile per axis
    Cq = C // 8

    ks = jax.random.split(key, 8)
    x = jax.random.normal(ks[0], (B, C, W, H), jnp.float32)
    wq = jax.random.normal(ks[1], (C, Cq), jnp.float32) * 0.1
    bq = jax.random.normal(ks[2], (Cq,), jnp.float32) * 0.1
    wk = jax.random.normal(ks[3], (C, Cq), jnp.float32) * 0.1
    bk = jax.random.normal(ks[4], (Cq,), jnp.float32) * 0.1
    wv = jax.random.normal(ks[5], (C, C), jnp.float32) * 0.1
    bv = jax.random.normal(ks[6], (C,), jnp.float32) * 0.1
    # Module inits gamma to 0; use a nonzero value so the attention path
    # contributes to the checked output.
    gamma = jnp.array([0.5], jnp.float32)

    out = self_attn_forward(x, wq, bq, wk, bk, wv, bv, gamma)
    out = jax.block_until_ready(out)

    ref = _reference(x, wq, bq, wk, bk, wv, bv, gamma)
    assert out.shape == (B, C, W, H)
    # Looser tolerance: matmul operands are bf16 (f32 accumulation) and the
    # softmax denominator uses the approx EUP reciprocal.
    assert jnp.allclose(out, ref, atol=5e-2, rtol=5e-2), \
        float(jnp.max(jnp.abs(out - ref)))

    print("KERNEL_OK")
</pallas_src>

<mosaic_0001>
module attributes {stable_mosaic.version = 11 : i64} {
  func.func @_proj_kernel(%arg0: i32, %arg1: i32, %arg2: memref<1x64x256xf32, #tpu.memory_space<vmem>>, %arg3: memref<64x384xbf16, #tpu.memory_space<vmem>>, %arg4: memref<1x384xf32, #tpu.memory_space<vmem>>, %arg5: memref<1x256x128xbf16, #tpu.memory_space<vmem>>, %arg6: memref<1x256x128xbf16, #tpu.memory_space<vmem>>, %arg7: memref<1x256x128xbf16, #tpu.memory_space<vmem>>) attributes {dimension_semantics = [#tpu.dimension_semantics<parallel>, #tpu.dimension_semantics<parallel>], iteration_bounds = array<i64: 2, 1>, scalar_prefetch = 0 : i64, scratch_operands = 0 : i64, tpu.core_type = #tpu.core_type<tc>, window_params = [{transform_indices = @transform_0, window_bounds = array<i64: 1, 64, 256>}, {pipeline_mode = #tpu.pipeline_mode<synchronous>, transform_indices = @transform_1, window_bounds = array<i64: 64, 384>}, {pipeline_mode = #tpu.pipeline_mode<synchronous>, transform_indices = @transform_2, window_bounds = array<i64: 1, 384>}, {transform_indices = @transform_3, window_bounds = array<i64: 1, 256, 128>}, {transform_indices = @transform_4, window_bounds = array<i64: 1, 256, 128>}, {transform_indices = @transform_5, window_bounds = array<i64: 1, 256, 128>}]} {
    %c0 = arith.constant 0 : index
    %c0_0 = arith.constant 0 : index
    %c0_1 = arith.constant 0 : index
    %0 = vector.load %arg2[%c0, %c0_0, %c0_1] : memref<1x64x256xf32, #tpu.memory_space<vmem>>, vector<1x64x256xf32>
    %1 = vector.shape_cast %0 : vector<1x64x256xf32> to vector<64x256xf32>
    %2 = arith.truncf %1 : vector<64x256xf32> to vector<64x256xbf16>
    %c0_2 = arith.constant 0 : index
    %c0_3 = arith.constant 0 : index
    %3 = vector.load %arg3[%c0_2, %c0_3] : memref<64x384xbf16, #tpu.memory_space<vmem>>, vector<64x384xbf16>
    %cst = arith.constant dense<0.000000e+00> : vector<256x384xf32>
    %4 = tpu.matmul %2, %3, %cst {dimension_numbers = #tpu.dot_dimension_numbers<[0], [0], [1], [1], [0, 1, 1, 1], [], []>} : vector<64x256xbf16>, vector<64x384xbf16>, vector<256x384xf32> -> vector<256x384xf32>
    %c0_4 = arith.constant 0 : index
    %c0_5 = arith.constant 0 : index
    %5 = vector.load %arg4[%c0_4, %c0_5] : memref<1x384xf32, #tpu.memory_space<vmem>>, vector<1x384xf32>
    %6 = vector.broadcast %5 : vector<1x384xf32> to vector<256x384xf32>
    %7 = arith.addf %4, %6 : vector<256x384xf32>
    %8 = vector.extract_strided_slice %7 {offsets = [0, 0], sizes = [256, 128], strides = [1, 1]} : vector<256x384xf32> to vector<256x128xf32>
    %9 = arith.truncf %8 : vector<256x128xf32> to vector<256x128xbf16>
    %c0_6 = arith.constant 0 : index
    %c0_7 = arith.constant 0 : index
    %c0_8 = arith.constant 0 : index
    %10 = vector.load %arg5[%c0_6, %c0_7, %c0_8] : memref<1x256x128xbf16, #tpu.memory_space<vmem>>, vector<1x256x128xbf16>
    %11 = vector.shape_cast %10 : vector<1x256x128xbf16> to vector<256x128xbf16>
    %12 = vector.shape_cast %9 : vector<256x128xbf16> to vector<1x256x128xbf16>
    tpu.vector_store %arg5[%c0_6, %c0_7, %c0_8], %12 {strides = array<i32>} : memref<1x256x128xbf16, #tpu.memory_space<vmem>>, vector<1x256x128xbf16>,
    %13 = vector.extract_strided_slice %7 {offsets = [0, 128], sizes = [256, 128], strides = [1, 1]} : vector<256x384xf32> to vector<256x128xf32>
    %14 = arith.truncf %13 : vector<256x128xf32> to vector<256x128xbf16>
    %c0_9 = arith.constant 0 : index
    %c0_10 = arith.constant 0 : index
    %c0_11 = arith.constant 0 : index
    %15 = vector.load %arg6[%c0_9, %c0_10, %c0_11] : memref<1x256x128xbf16, #tpu.memory_space<vmem>>, vector<1x256x128xbf16>
    %16 = vector.shape_cast %15 : vector<1x256x128xbf16> to vector<256x128xbf16>
    %17 = vector.shape_cast %14 : vector<256x128xbf16> to vector<1x256x128xbf16>
    tpu.vector_store %arg6[%c0_9, %c0_10, %c0_11], %17 {strides = array<i32>} : memref<1x256x128xbf16, #tpu.memory_space<vmem>>, vector<1x256x128xbf16>,
    %18 = vector.extract_strided_slice %7 {offsets = [0, 256], sizes = [256, 128], strides = [1, 1]} : vector<256x384xf32> to vector<256x128xf32>
    %19 = arith.truncf %18 : vector<256x128xf32> to vector<256x128xbf16>
    %c0_12 = arith.constant 0 : index
    %c0_13 = arith.constant 0 : index
    %c0_14 = arith.constant 0 : index
    %20 = vector.load %arg7[%c0_12, %c0_13, %c0_14] : memref<1x256x128xbf16, #tpu.memory_space<vmem>>, vector<1x256x128xbf16>
    %21 = vector.shape_cast %20 : vector<1x256x128xbf16> to vector<256x128xbf16>
    %22 = vector.shape_cast %19 : vector<256x128xbf16> to vector<1x256x128xbf16>
    tpu.vector_store %arg7[%c0_12, %c0_13, %c0_14], %22 {strides = array<i32>} : memref<1x256x128xbf16, #tpu.memory_space<vmem>>, vector<1x256x128xbf16>,
    return
  }
  func.func @transform_0(%arg0: i32, %arg1: i32) -> (i32, i32, i32) {
    %c0_i32 = arith.constant 0 : i32
    %c0_i32_0 = arith.constant 0 : i32
    return %arg0, %c0_i32, %arg1 : i32, i32, i32
  }
  func.func @transform_1(%arg0: i32, %arg1: i32) -> (i32, i32) {
    %c0_i32 = arith.constant 0 : i32
    %c0_i32_0 = arith.constant 0 : i32
    %c0_i32_1 = arith.constant 0 : i32
    return %c0_i32, %c0_i32_0 : i32, i32
  }
  func.func @transform_2(%arg0: i32, %arg1: i32) -> (i32, i32) {
    %c0_i32 = arith.constant 0 : i32
    %c0_i32_0 = arith.constant 0 : i32
    %c0_i32_1 = arith.constant 0 : i32
    return %c0_i32, %c0_i32_0 : i32, i32
  }
  func.func @transform_3(%arg0: i32, %arg1: i32) -> (i32, i32, i32) {
    %c0_i32 = arith.constant 0 : i32
    %c0_i32_0 = arith.constant 0 : i32
    return %arg0, %arg1, %c0_i32 : i32, i32, i32
  }
  func.func @transform_4(%arg0: i32, %arg1: i32) -> (i32, i32, i32) {
    %c0_i32 = arith.constant 0 : i32
    %c0_i32_0 = arith.constant 0 : i32
    return %arg0, %arg1, %c0_i32 : i32, i32, i32
  }
  func.func @transform_5(%arg0: i32, %arg1: i32) -> (i32, i32, i32) {
    %c0_i32 = arith.constant 0 : i32
    %c0_i32_0 = arith.constant 0 : i32
    return %arg0, %arg1, %c0_i32 : i32, i32, i32
  }
}

</mosaic_0001>

<bundles_post_ra>
// kernel: tpu_custom_call.1
= control target key start
LH: loop header
LB: loop body
LE: loop exit
PB: predicated region body
PF: predicated region fallthrough
CT: control target
= control target key end

     0   :  { %s3027_s0 = inlined_call_operand.hbm [shape: f32[2,64,256], index: 0, kind: input, shape index: {}]   ;;  %s3028_s1 = inlined_call_operand.hbm [shape: bf16[64,384], index: 1, kind: input, shape index: {}]   ;;  %s3029_s2 = inlined_call_operand.vmem [shape: f32[1,384], index: 2, kind: input, shape index: {}]   ;;  %s3030_s3 = inlined_call_operand.hbm [shape: bf16[2,256,128], index: 3, kind: output, shape index: {0}]   ;;  %s3031_s4 = inlined_call_operand.hbm [shape: bf16[2,256,128], index: 4, kind: output, shape index: {1}]   ;;  %s3032_s5 = inlined_call_operand.hbm [shape: bf16[2,256,128], index: 5, kind: output, shape index: {2}]  }
   0x1   :  { %3036 = sst [smem:[#allocation16_spill]] %s3028_s1 }
   0x2   :  { %11 = vsyncpa [#allocation3], 0 }
   0x3   :  { %13 = vsyncpa [#allocation3 + $0x1], 0 }
   0x4   :  { %14 = vsyncpa [#allocation6], 0 }
   0x5   :  { %15 = vsyncpa [#allocation4], 0 }
   0x6   :  { %17 = vsyncpa [#allocation4 + $0x1], 0 }
   0x7   :  { %18 = vsyncpa [#allocation9], 0 }
   0x8   :  { %20 = vsyncpa [#allocation9 + $0x1], 0  ;;  %s2527_s18 = smov 0   ;;  %s2529_s19 = smov 0  }
   0x9   :  { %s2531_s20 = smov 0   ;;  %s2533_s21 = smov 0  }
   0xa   :  { %s2535_s22 = smov 0   ;;  %s2537_s23 = smov 0  }
   0xb LB: > { %s2558_s24 = sadd.s32 4294967295, %s2483_s23   ;;  %s3033_s25 = sadd.s32 4294967294, %s2483_s23   ;;  %s2483_s23 = sphi %s2537_s23, %s26_s23   ;;  %s2479_s22 = sphi %s2535_s22, %s3059_s22   ;;  %s2475_s21 = sphi %s2533_s21, %s3058_s21   ;;  %s2471_s20 = sphi %s2531_s20, %s3057_s20   ;;  %s2467_s19 = sphi %s2529_s19, %s3056_s19   ;;  %s2463_s18 = sphi %s2527_s18, %s3055_s18  }
   0xc   : > { %p60_p0 = scmp.ne.s32.totalorder %s2467_s19, %s2463_s18  ;;  %p3035_p1 = scmp.eq.s32.totalorder %s2558_s24, 0 }
   0xd   : > { %p134_p3 = scmp.eq.s32.totalorder %s3033_s25, 1  ;;  %p1567_p5 = scmp.ge.s32.totalorder %s2483_s23, 1 }
   0xe   : > { %p2569_p4 = por %p3035_p1, %p60_p0  ;;  %p197_p7 = scmp.lt.s32.totalorder %s2483_s23, 3 }
   0xf   : > { %p2574_p6 = por %p134_p3, %p60_p0  ;;  %s2485_s29 = smov [#allocation5]  }
  0x10   : > { %p2579_p8 = pnand %p1567_p5, %p197_p7  ;;  %s209_s30 = sshll.u32 %s2485_s29, 4  ;;  %s210_s30 = int_to_ptr.vmem [resolvable:$true] %s209_s30 }
  0x11   : > { %s3038_s27 = scalar_select %p2574_p6, 1, 0 }
  0x12   : > { %p2195_p9 = pneg %p2579_p8  ;;  %s38_s7 = sadd.s32 1, %s2479_s22 }
  0x13   : > { %s2300_s8 = scalar_lea.vmem %s210_s30, 1536  ;;  %p2308_p5 = scmp.lt.s32.totalorder %s210_s30, %s210_s30 }
  0x14   : > { %p2588_p11 = pnand %p2195_p9, %p3035_p1  ;;  %p2301_p13 = scmp.ne.s32.totalorder %s210_s30, %s2300_s8 }
  0x15   : > { %p2309_p7 = scmp.lt.s32.totalorder %s2300_s8, %s2300_s8 }
  0x16   : > { %p2291_p12 = pneg %p2588_p11 }
  0x17   : > { %p2310_p2 = por %p2309_p7, %p2308_p5 }
  0x18   : > { %p2303_p0 = pnand %p2301_p13, %p2291_p12 }
  0x1a   : > { %p2304_p3 = pneg %p2303_p0 }
  0x1c   : > { %p2311_p6 = pnand %p2310_p2, %p2304_p3 }
  0x1e   : > { %2314 = shalt.err (!%p2311_p6)
}
  0x1f   : > { %s2486_s9 = smov 192   ;;  %s2487_s10 = smov 12  }
  0x20   : > { %s3041_s1 = sld [smem:[#allocation16_spill]]  ;;  %p40_p2 = scmp.ge.s32.totalorder %s38_s7, 2 }
  0x21   : > { %s47_s13 = sadd.s32 1, %s2471_s20  ;;  %p54_p6 = scmp.ne.s32.totalorder %s2471_s20, %s2467_s19 }
  0x22   : > { %p55_p9 = scmp.eq.s32.totalorder %s2483_s23, 0  ;;  %s3061_s7 = smov (%p40_p2, %s38_s7), 0 }
  0x23   : > { %3042 = sst [smem:[#allocation15_spill]] %s3061_s7  ;;  %p3044_p13 = scmp.eq.s32.totalorder %s2558_s24, 1 }
  0x24   : > { %p2606_p12 = por %p55_p9, %p54_p6  ;;  %s42_s16 = ssub.s32 %s2479_s22, %s3061_s7 }
  0x25   : > { %p2612_p0 = por %p3044_p13, %p54_p6  ;;  %p2214_p3 = scmp.lt.s32.totalorder %s2483_s23, 2 }
  0x26   : > { %2198 = dma.hbm_to_vmem [thread:$0]  (!%p2588_p11), %s3041_s1, 1536, %s210_s30, [#allocation6], %s2486_s9, %s2486_s9, %s2487_s10  }
  0x27   : > { %p45_p11 = scmp.eq.s32.totalorder %s42_s16, 0  ;;  %s226_s17 = sand.u32 1, %s2471_s20  }
  0x28   : > { %s1570_s29 = sshll.u32 %s226_s17, 7  ;;  %s1730_s6 = sshll.u32 %s2479_s22, 11 }
  0x29   : > { %s2621_s30 = scalar_select %p45_p11, %s2471_s20, %s47_s13  }
  0x2a   : > { %s238_s10 = scalar_lea.hbm %s3027_s0, %s1730_s6  ;;  %s230_s11 = scalar_lea.vmem [#allocation2], %s1570_s29 }
  0x2b   : > { %s239_s12 = sshll.u32 %s230_s11, 4  ;;  %p2629_p5 = pnand %p2214_p3, %p2606_p12  ;;  %s240_s12 = int_to_ptr.vmem [resolvable:$true] %s239_s12 }
  0x2c   : > { %s227_s1 = scalar_lea.sflag [#allocation3], %s226_s17  ;;  %s2328_s16 = scalar_lea.vmem %s240_s12, 2048 }
  0x2d   : > { %p2317_p7 = pneg %p2629_p5  ;;  %p2329_p2 = scmp.ne.s32.totalorder %s240_s12, %s2328_s16 }
  0x2e   : > { %s2488_s13 = smov [#allocation2]  }
  0x2f   : > { %p2331_p6 = pnand %p2329_p2, %p2317_p7  ;;  %s2333_s7 = sshll.u32 %s2488_s13, 4  ;;  %s2334_s7 = int_to_ptr.vmem [resolvable:$false] %s2333_s7 }
  0x30   : > { %s2335_s6 = scalar_lea.vmem %s2334_s7, 4096  ;;  %p2336_p13 = scmp.lt.s32.totalorder %s240_s12, %s2334_s7 }
  0x31   : > { %p2332_p9 = pneg %p2331_p6  ;;  %p2337_p11 = scmp.lt.s32.totalorder %s2335_s6, %s2328_s16 }
  0x33   : > { %p2338_p10 = por %p2337_p11, %p2336_p13 }
  0x35   : > { %p2339_p1 = pnand %p2338_p10, %p2332_p9 }
  0x37   : > { %2342 = shalt.err (!%p2339_p1)
}
  0x38   : > { %s2489_s14 = smov 256   ;;  %s2490_s29 = smov 16  }
  0x39   : > { %2202 = dma.hbm_to_vmem [thread:$0]  (!%p2629_p5), %s238_s10, 2048, %s240_s12, %s227_s1, %s2489_s14, %s2489_s14, %s2490_s29  }
  0x3a   : > { %251 = sbr.rel (%p2579_p8) target bundleno = 527 (0x20f), region = 32  ;;  %s2640_s17 = sand.u32 (!%p2579_p8), 1, %s2467_s19  }
  0x3b   : > { %s2643_s8 = sshll.u32 (!%p2579_p8), %s2640_s17, 7  ;;  %s254_s7 = scalar_lea.sflag (!%p2579_p8), [#allocation3], %s2640_s17 }
  0x3c   : > { %s2647_s9 = scalar_lea.vmem (!%p2579_p8), [#allocation2], %s2643_s8 }
  0x3f   : > { %2446 = dma.done.wait (%p2569_p4), %s254_s7, 2048  }
  0x40   : > { %2448 = vsyncadd (%p2569_p4), %s254_s7, 4294965248  ;;  %p3047_p1 = scmp.eq.s32.totalorder %s2558_s24, 0 }
  0x42   : > { %2450 = dma.done.wait (%p3047_p1), [#allocation6], 1536   ;;  %p3048_p8 = pmov %p3047_p1 }
  0x43   : > { %v2491_v0 = vmov 0   ;;  %v304_v1 = vld [vmem:[%s2647_s9 + $0x8] sm:$0xff]  ;;  %v306_v2 = vld [vmem:[%s2647_s9 + $0x18] sm:$0xff]  ;;  %v303_v3 = vld [vmem:[%s2647_s9] sm:$0xff]  ;;  %vm456_vm0 = vcmask 523264   ;;  %v345_v53 = vlaneseq  ;;  %s2741_s26 = scalar_lea.vmem [#allocation7], %s2643_s8 }
  0x44   : > { %2452 = vsyncadd (%p3048_p8), [#allocation6], 4294965760  ;;  %537 = vmatprep.mubr.bf16.mxu0 %v2491_v0  ;;  %657 = vmatprep.mubr.bf16.mxu1 %v2491_v0  ;;  %v320_v4 = vpack.c.bf16 %v306_v2, %v304_v1  ;;  %v305_v5 = vld [vmem:[%s2647_s9 + $0x10] sm:$0xff]  ;;  %v308_v6 = vld [vmem:[%s2647_s9 + $0x28] sm:$0xff]  ;;  %s2745_s28 = scalar_lea.vmem [#allocation8], %s2643_s8  ;;  %s2815_s10 = scalar_lea.vmem [#allocation10], %s2643_s8 }
  0x45   : > { %v310_v7 = vld [vmem:[%s2647_s9 + $0x38] sm:$0xff]  ;;  %v319_v8 = vpack.c.bf16 %v305_v5, %v303_v3  ;;  %v307_v9 = vld [vmem:[%s2647_s9 + $0x20] sm:$0xff]  ;;  %v309_v10 = vld [vmem:[%s2647_s9 + $0x30] sm:$0xff]  ;;  %v2721_v54 = vshrl.u32 %v345_v53, 7  ;;  %s2873_s12 = sshll.u32 %s2475_s21, 11  ;;  %s1365_s16 = sshll.u32 %s2741_s26, 4  ;;  %s2889_s16 = int_to_ptr.vmem [resolvable:$true] %s1365_s16 }
  0x46   : > { %376 = vxpose.xlu0.c.b16.start [1/4] (short) %v320_v4, 128  ;;  %v322_v11 = vpack.c.bf16 %v310_v7, %v308_v6  ;;  %v321_v12 = vpack.c.bf16 %v309_v10, %v307_v9  ;;  %v312_v13 = vld [vmem:[%s2647_s9 + $0x48] sm:$0xff]  ;;  %v314_v14 = vld [vmem:[%s2647_s9 + $0x58] sm:$0xff]  ;;  %v311_v15 = vld [vmem:[%s2647_s9 + $0x40] sm:$0xff]  ;;  %s1383_s21 = sshll.u32 %s2745_s28, 4  ;;  %s2887_s14 = scalar_lea.hbm %s3030_s3, %s2873_s12  ;;  %s2899_s21 = int_to_ptr.vmem [resolvable:$true] %s1383_s21 }
  0x47   : > { %360 = vxpose.xlu1.c.b16.start [1/4] (short) %v319_v8, 128  ;;  %v313_v16 = vld [vmem:[%s2647_s9 + $0x50] sm:$0xff]  ;;  %v316_v17 = vld [vmem:[%s2647_s9 + $0x68] sm:$0xff]  ;;  %v318_v18 = vld [vmem:[%s2647_s9 + $0x78] sm:$0xff]  ;;  %v324_v21 = vpack.c.bf16 %v314_v14, %v312_v13  ;;  %v347_v55 = vsub.s32 0, %v2721_v54  ;;  %v351_v57 = vsub.s32 1, %v2721_v54  ;;  %s2897_s7 = scalar_lea.hbm %s3031_s4, %s2873_s12  ;;  %s2343_s1 = scalar_lea.vmem %s2889_s16, 2048 }
  0x48   : > { %v2273_v19 = vld [vmem:[#allocation5 + $0x4c] ss:$12 sps:$4 sm:$0xff]   ;;  %v2275_v20 = vld [vmem:[#allocation5 + $0x48] ss:$12 sps:$4 sm:$0xff]   ;;  %v315_v22 = vld [vmem:[%s2647_s9 + $0x60] sm:$0xff]  ;;  %v323_v24 = vpack.c.bf16 %v313_v16, %v311_v15  ;;  %v326_v28 = vpack.c.bf16 %v318_v18, %v316_v17  ;;  %p2344_p4 = scmp.ne.s32.totalorder %s2889_s16, %s2343_s1  ;;  %s2492_s25 = smov [#allocation7]  }
  0x49   : > { %v2276_v23 = vld [vmem:[#allocation5 + $0x34] ss:$12 sps:$4 sm:$0xff]   ;;  %513 = vmatprep.subr.bf16.mxu0 %v2273_v19  ;;  %v2278_v26 = vld [vmem:[#allocation5 + $0x30] ss:$12 sps:$4 sm:$0xff]   ;;  %2175 = vmatprep.subr.bf16.mxu1 %v2273_v19  ;;  %v2281_v30 = vld [vmem:[#allocation5 + $0x18] ss:$12 sps:$4 sm:$0xff]  }
  0x4a   : > { %377 = vxpose.xlu0.c.b16.cont [2/4] (short) %v322_v11, 128  ;;  %v317_v25 = vld [vmem:[%s2647_s9 + $0x70] sm:$0xff]  ;;  %514 = vmatpush1.bf16.msra.mxu0 %v2275_v20  ;;  %v2279_v27 = vld [vmem:[#allocation5 + $0x1c] ss:$12 sps:$4 sm:$0xff]   ;;  %v2284_v32 = vld [vmem:[#allocation5] ss:$12 sps:$4 sm:$0xff]   ;;  %p2345_p10 = pnand %p2344_p4, %p2612_p0  ;;  %s2347_s13 = sshll.u32 %s2492_s25, 4  ;;  %s2348_s13 = int_to_ptr.vmem [resolvable:$false] %s2347_s13 }
  0x4b   : > { %361 = vxpose.xlu1.c.b16.cont [2/4] (short) %v321_v12, 128  ;;  %515 = vmatprep.subr.bf16.mxu0 %v2276_v23  ;;  %v325_v29 = vpack.c.bf16 %v317_v25, %v315_v22  ;;  %v2282_v31 = vld [vmem:[#allocation5 + $0x4] ss:$12 sps:$4 sm:$0xff]   ;;  %v2287_v43 = vld [vmem:[#allocation5 + $0x20] ss:$12 sps:$4 sm:$0xff]   ;;  %v2288_v46 = vld [vmem:[#allocation5 + $0x8] ss:$12 sps:$4 sm:$0xff]   ;;  %p2350_p3 = scmp.lt.s32.totalorder %s2889_s16, %s2348_s13 }
  0x4c   : > { %2179 = vmatpush1.bf16.msra.mxu1 %v2275_v20  ;;  %v2285_v33 = vld [vmem:[#allocation5 + $0x50] ss:$12 sps:$4 sm:$0xff]   ;;  %v2286_v41 = vld [vmem:[#allocation5 + $0x38] ss:$12 sps:$4 sm:$0xff]   ;;  %v2727_v56 = vld [vmem:[%s3029_s2] sm:$0x7]  ;;  %p2346_p12 = pneg %p2345_p10 }
  0x4d   : > { %2176 = vmatprep.subr.bf16.mxu1 %v2276_v23  ;;  %v2731_v58 = vrot.slane %v2727_v56, %v347_v55  ;;  %v2734_v60 = vrot.slane %v2727_v56, %v351_v57 }
  0x4e   : > { %378 = vxpose.xlu0.c.b16.cont [3/4] (short) %v324_v21, 128  ;;  %516 = vmatpush1.bf16.msra.mxu0 %v2278_v26 }
  0x4f   : > { %362 = vxpose.xlu1.c.b16.cont [3/4] (short) %v323_v24, 128  ;;  %517 = vmatprep.subr.bf16.mxu0 %v2279_v27 }
  0x50   : > { %2180 = vmatpush1.bf16.msra.mxu1 %v2278_v26 }
  0x51   : > { %2177 = vmatprep.subr.bf16.mxu1 %v2279_v27 }
  0x52   : > { %379 = vxpose.xlu0.c.b16.end [4/4] (short) %v326_v28, 128  ;;  %518 = vmatpush1.bf16.msra.mxu0 %v2281_v30 }
  0x53   : > { %363 = vxpose.xlu1.c.b16.end [4/4] (short) %v325_v29, 128  ;;  %519 = vmatprep.subr.bf16.mxu0 %v2282_v31 }
  0x54   : > { %2181 = vmatpush1.bf16.msra.mxu1 %v2281_v30 }
  0x55   : > { %2178 = vmatprep.subr.bf16.mxu1 %v2282_v31 }
  0x56   : > { %520 = vmatpush1.bf16.msra.mxu0 %v2284_v32 }
  0x58   : > { %2182 = vmatpush1.bf16.msra.mxu1 %v2284_v32 }
  0x59   : > { %2135 = vmatprep.subr.bf16.mxu1 %v2285_v33 }
  0xa8   : > { %v384_v34 = vpop.trf.xlu0 }
  0xa9   : > { %v368_v35 = vpop.trf.xlu1 }
  0xaa   : > { %1591 = vmatmul.mubr.msk.bf16.vlgmr.msra.gmra.mxu0 %vm456_vm0, %v368_v35 }
  0xab   : > { %547 = vmatprep.mubr.bf16.mxu0 %v2491_v0 }
  0xac   : > { %v385_v36 = vpop.trf.xlu0 }
  0xad   : > { %v369_v37 = vpop.trf.xlu1 }
  0xb0   : > { %v386_v38 = vpop.trf.xlu0 }
  0xb1   : > { %v370_v40 = vpop.trf.xlu1 }
  0xb2   : > { %1592 = vmatmul.mubr.msk.bf16.gmra.mxu0 %vm456_vm0, %v369_v37 }
  0xb3   : > { %557 = vmatprep.mubr.bf16.mxu0 %v2491_v0 }
  0xb4   : > { %v387_v39 = vpop.trf.xlu0 }
  0xb5   : > { %v371_v45 = vpop.trf.xlu1 }
  0xb8   : > { %v388_v42 = vpop.trf.xlu0 }
  0xb9   : > { %1603 = vmatmul.mubr.msk.bf16.vlgmr.msra.gmra.mxu1 %vm456_vm0, %v388_v42  ;;  %v372_v48 = vpop.trf.xlu1 }
  0xba   : > { %1593 = vmatmul.mubr.msk.bf16.gmra.mxu0 %vm456_vm0, %v370_v40  ;;  %2136 = vmatpush3.bf16.msra.mxu1 %v2285_v33 }
  0xbb   : > { %667 = vmatprep.mubr.bf16.mxu1 %v2491_v0  ;;  %2137 = vmatprep.subr.bf16.mxu1 %v2286_v41 }
  0xbc   : > { %567 = vmatprep.mubr.bf16.mxu0 %v2491_v0  ;;  %v389_v44 = vpop.trf.xlu0 }
  0xbd   : > { %v373_v50 = vpop.trf.xlu1 }
  0xbe   : > { %2138 = vmatpush3.bf16.msra.mxu1 %v2286_v41 }
  0xbf   : > { %2139 = vmatprep.subr.bf16.mxu1 %v2287_v43 }
  0xc0   : > { %v390_v47 = vpop.trf.xlu0 }
  0xc1   : > { %1604 = vmatmul.mubr.msk.bf16.gmra.mxu1 %vm456_vm0, %v389_v44  ;;  %v374_v51 = vpop.trf.xlu1 }
  0xc2   : > { %1594 = vmatmul.mubr.msk.bf16.gmra.mxu0 %vm456_vm0, %v371_v45  ;;  %677 = vmatprep.mubr.bf16.mxu1 %v2491_v0 }
  0xc3   : > { %577 = vmatprep.mubr.bf16.mxu0 %v2491_v0  ;;  %2140 = vmatpush3.bf16.msra.mxu1 %v2287_v43 }
  0xc4   : > { %2141 = vmatprep.subr.bf16.mxu1 %v2288_v46  ;;  %v391_v49 = vpop.trf.xlu0 }
  0xc5   : > { %v375_v52 = vpop.trf.xlu1 }
  0xc7   : > { %2142 = vmatpush3.bf16.msra.mxu1 %v2288_v46 }
  0xc9   : > { %1605 = vmatmul.mubr.msk.bf16.gmra.mxu1 %vm456_vm0, %v390_v47 }
  0xca   : > { %1595 = vmatmul.mubr.msk.bf16.gmra.mxu0 %vm456_vm0, %v372_v48  ;;  %687 = vmatprep.mubr.bf16.mxu1 %v2491_v0 }
  0xcb   : > { %587 = vmatprep.mubr.bf16.mxu0 %v2491_v0 }
  0xd1   : > { %1606 = vmatmul.mubr.msk.bf16.gmra.mxu1 %vm456_vm0, %v391_v49 }
  0xd2   : > { %1596 = vmatmul.mubr.msk.bf16.gmra.mxu0 %vm456_vm0, %v373_v50  ;;  %2143 = vmatprep.mubr.msk.bf16.mxu1 %vm456_vm0, %v368_v35 }
  0xd3   : > { %597 = vmatprep.mubr.bf16.mxu0 %v2491_v0 }
  0xd9   : > { %2144 = vmatmul.mubr.msk.bf16.vlgmr.msra.gmra.mxu1 %vm456_vm0, %v369_v37 }
  0xda   : > { %1597 = vmatmul.mubr.msk.bf16.gmra.mxu0 %vm456_vm0, %v374_v51  ;;  %2147 = vmatprep.mubr.msk.bf16.mxu1 %vm456_vm0, %v370_v40 }
  0xdb   : > { %607 = vmatprep.mubr.bf16.mxu0 %v2491_v0 }
  0xe1   : > { %2148 = vmatmul.mubr.msk.bf16.gmra.mxu1 %vm456_vm0, %v371_v45 }
  0xe2   : > { %1598 = vmatmul.mubr.msk.bf16.gmra.mxu0 %vm456_vm0, %v375_v52  ;;  %2151 = vmatprep.mubr.msk.bf16.mxu1 %vm456_vm0, %v372_v48 }
  0xe3   : > { %617 = vmatprep.mubr.bf16.mxu0 %v2491_v0 }
  0xe9   : > { %2152 = vmatmul.mubr.msk.bf16.gmra.mxu1 %vm456_vm0, %v373_v50 }
  0xea   : > { %1599 = vmatmul.mubr.msk.bf16.gmra.mxu0 %vm456_vm0, %v384_v34  ;;  %2155 = vmatprep.mubr.msk.bf16.mxu1 %vm456_vm0, %v374_v51 }
  0xeb   : > { %627 = vmatprep.mubr.bf16.mxu0 %v2491_v0 }
  0xf1   : > { %2156 = vmatmul.mubr.msk.bf16.gmra.mxu1 %vm456_vm0, %v375_v52 }
  0xf2   : > { %1600 = vmatmul.mubr.msk.bf16.gmra.mxu0 %vm456_vm0, %v385_v36  ;;  %2159 = vmatprep.mubr.msk.bf16.mxu1 %vm456_vm0, %v384_v34 }
  0xf3   : > { %637 = vmatprep.mubr.bf16.mxu0 %v2491_v0 }
  0xf9   : > { %2160 = vmatmul.mubr.msk.bf16.gmra.mxu1 %vm456_vm0, %v385_v36 }
  0xfa   : > { %1601 = vmatmul.mubr.msk.bf16.gmra.mxu0 %vm456_vm0, %v386_v38  ;;  %2163 = vmatprep.mubr.msk.bf16.mxu1 %vm456_vm0, %v386_v38 }
  0xfb   : > { %647 = vmatprep.mubr.bf16.mxu0 %v2491_v0 }
 0x101   : > { %2164 = vmatmul.mubr.msk.bf16.gmra.mxu1 %vm456_vm0, %v387_v39 }
 0x102   : > { %1602 = vmatmul.mubr.msk.bf16.gmra.mxu0 %vm456_vm0, %v387_v39  ;;  %2167 = vmatprep.mubr.msk.bf16.mxu1 %vm456_vm0, %v388_v42 }
 0x109   : > { %2168 = vmatmul.mubr.msk.bf16.gmra.mxu1 %vm456_vm0, %v389_v44 }
 0x10a   : > { %2171 = vmatprep.mubr.msk.bf16.mxu1 %vm456_vm0, %v390_v47 }
 0x111   : > { %2172 = vmatmul.mubr.msk.bf16.gmra.mxu1 %vm456_vm0, %v391_v49 }
 0x16a   : > { %v539_v59 = vpop.f32.mrf.mxu0 }
 0x16b   : > { %v540_v62 = vadd.f32 %v539_v59, %v2731_v58 }
 0x16c   : > { %v541_v61 = vpop.f32.mrf.mxu0 }
 0x16d   : > { %v542_v0 = vadd.f32 %v541_v61, %v2734_v60 }
 0x16e   : > { %v543_v63 = vpop.f32.mrf.mxu0 }
 0x16f   : > { %v544_v1 = vadd.f32 %v543_v63, %v2731_v58 }
 0x170   : > { %v545_v2 = vpop.f32.mrf.mxu0 }
 0x171   : > { %v1833_v3 = vpack.c.bf16 %v544_v1, %v540_v62  ;;  %v546_v4 = vadd.f32 %v545_v2, %v2734_v60 }
 0x172   : > { %v549_v5 = vpop.f32.mrf.mxu0 }
 0x173   : > { %1834 = vst [vmem:[%s2741_s26] sm:$0xff] %v1833_v3   ;;  %v1913_v6 = vpack.c.bf16 %v546_v4, %v542_v0  ;;  %v550_v8 = vadd.f32 %v549_v5, %v2731_v58 }
 0x174   : > { %v551_v7 = vpop.f32.mrf.mxu0 }
 0x175   : > { %1914 = vst [vmem:[%s2745_s28] sm:$0xff] %v1913_v6   ;;  %v552_v10 = vadd.f32 %v551_v7, %v2734_v60 }
 0x176   : > { %v553_v9 = vpop.f32.mrf.mxu0 }
 0x177   : > { %v554_v11 = vadd.f32 %v553_v9, %v2731_v58 }
 0x178   : > { %v555_v12 = vpop.f32.mrf.mxu0 }
 0x179   : > { %v1838_v13 = vpack.c.bf16 %v554_v11, %v550_v8  ;;  %v556_v14 = vadd.f32 %v555_v12, %v2734_v60  ;;  %v659_v15 = vpop.f32.mrf.mxu1 }
 0x17a   : > { %v559_v16 = vpop.f32.mrf.mxu0  ;;  %v660_v22 = vadd.f32 %v659_v15, %v2731_v58 }
 0x17b   : > { %2070 = vst [vmem:[%s2741_s26 + $0x8] sm:$0xff] %v1838_v13   ;;  %v1918_v17 = vpack.c.bf16 %v556_v14, %v552_v10  ;;  %v661_v18 = vpop.f32.mrf.mxu1  ;;  %v560_v20 = vadd.f32 %v559_v16, %v2731_v58 }
 0x17c   : > { %v561_v19 = vpop.f32.mrf.mxu0  ;;  %v662_v28 = vadd.f32 %v661_v18, %v2734_v60 }
 0x17d   : > { %2085 = vst [vmem:[%s2745_s28 + $0x8] sm:$0xff] %v1918_v17   ;;  %v663_v21 = vpop.f32.mrf.mxu1  ;;  %v562_v25 = vadd.f32 %v561_v19, %v2734_v60 }
 0x17e   : > { %v563_v23 = vpop.f32.mrf.mxu0  ;;  %v664_v24 = vadd.f32 %v663_v21, %v2731_v58 }
 0x17f   : > { %v564_v26 = vadd.f32 %v563_v23, %v2731_v58  ;;  %v665_v27 = vpop.f32.mrf.mxu1 }
 0x180   : > { %v1893_v29 = vpack.c.bf16 %v664_v24, %v660_v22  ;;  %v565_v30 = vpop.f32.mrf.mxu0  ;;  %v666_v31 = vadd.f32 %v665_v27, %v2734_v60 }
 0x181   : > { %v1843_v32 = vpack.c.bf16 %v564_v26, %v560_v20  ;;  %v566_v33 = vadd.f32 %v565_v30, %v2734_v60  ;;  %v669_v34 = vpop.f32.mrf.mxu1 }
 0x182   : > { %2081 = vst [vmem:[%s2741_s26 + $0x60] sm:$0xff] %v1893_v29   ;;  %v1973_v35 = vpack.c.bf16 %v666_v31, %v662_v28  ;;  %v569_v36 = vpop.f32.mrf.mxu0  ;;  %v670_v42 = vadd.f32 %v669_v34, %v2731_v58 }
 0x183   : > { %2071 = vst [vmem:[%s2741_s26 + $0x10] sm:$0xff] %v1843_v32   ;;  %v1923_v37 = vpack.c.bf16 %v566_v33, %v562_v25  ;;  %v671_v38 = vpop.f32.mrf.mxu1  ;;  %v570_v40 = vadd.f32 %v569_v36, %v2731_v58  ;;  %v355_v25 = vsub.s32 2, %v2721_v54 }
 0x184   : > { %2096 = vst [vmem:[%s2745_s28 + $0x60] sm:$0xff] %v1973_v35   ;;  %v571_v39 = vpop.f32.mrf.mxu0  ;;  %v672_v48 = vadd.f32 %v671_v38, %v2734_v60 }
 0x185   : > { %2086 = vst [vmem:[%s2745_s28 + $0x10] sm:$0xff] %v1923_v37   ;;  %v673_v41 = vpop.f32.mrf.mxu1  ;;  %v572_v45 = vadd.f32 %v571_v39, %v2734_v60  ;;  %v2801_v37 = vrot.slane %v2727_v56, %v355_v25 }
 0x186   : > { %v573_v43 = vpop.f32.mrf.mxu0  ;;  %v674_v44 = vadd.f32 %v673_v41, %v2731_v58 }
 0x187   : > { %v574_v46 = vadd.f32 %v573_v43, %v2731_v58  ;;  %v675_v47 = vpop.f32.mrf.mxu1 }
 0x188   : > { %v1898_v49 = vpack.c.bf16 %v674_v44, %v670_v42  ;;  %v575_v50 = vpop.f32.mrf.mxu0  ;;  %v676_v51 = vadd.f32 %v675_v47, %v2734_v60 }
 0x189   : > { %v1848_v52 = vpack.c.bf16 %v574_v46, %v570_v40  ;;  %v576_v53 = vadd.f32 %v575_v50, %v2734_v60  ;;  %v679_v55 = vpop.f32.mrf.mxu1 }
 0x18a   : > { %2082 = vst [vmem:[%s2741_s26 + $0x68] sm:$0xff] %v1898_v49   ;;  %v1978_v57 = vpack.c.bf16 %v676_v51, %v672_v48  ;;  %v579_v59 = vpop.f32.mrf.mxu0  ;;  %v680_v2 = vadd.f32 %v679_v55, %v2731_v58 }
 0x18b   : > { %2072 = vst [vmem:[%s2741_s26 + $0x18] sm:$0xff] %v1848_v52   ;;  %v1928_v61 = vpack.c.bf16 %v576_v53, %v572_v45  ;;  %v681_v62 = vpop.f32.mrf.mxu1  ;;  %v580_v0 = vadd.f32 %v579_v59, %v2731_v58 }
 0x18c   : > { %2097 = vst [vmem:[%s2745_s28 + $0x68] sm:$0xff] %v1978_v57   ;;  %v581_v63 = vpop.f32.mrf.mxu0  ;;  %v682_v8 = vadd.f32 %v681_v62, %v2734_v60 }
 0x18d   : > { %2087 = vst [vmem:[%s2745_s28 + $0x18] sm:$0xff] %v1928_v61   ;;  %v683_v1 = vpop.f32.mrf.mxu1  ;;  %v582_v5 = vadd.f32 %v581_v63, %v2734_v60 }
 0x18e   : > { %v583_v3 = vpop.f32.mrf.mxu0  ;;  %v684_v4 = vadd.f32 %v683_v1, %v2731_v58 }
 0x18f   : > { %v584_v6 = vadd.f32 %v583_v3, %v2731_v58  ;;  %v685_v7 = vpop.f32.mrf.mxu1 }
 0x190   : > { %v1903_v9 = vpack.c.bf16 %v684_v4, %v680_v2  ;;  %v585_v10 = vpop.f32.mrf.mxu0  ;;  %v686_v11 = vadd.f32 %v685_v7, %v2734_v60 }
 0x191   : > { %v1853_v12 = vpack.c.bf16 %v584_v6, %v580_v0  ;;  %v586_v13 = vadd.f32 %v585_v10, %v2734_v60  ;;  %v689_v14 = vpop.f32.mrf.mxu1 }
 0x192   : > { %2083 = vst [vmem:[%s2741_s26 + $0x70] sm:$0xff] %v1903_v9   ;;  %v1983_v15 = vpack.c.bf16 %v686_v11, %v682_v8  ;;  %v589_v16 = vpop.f32.mrf.mxu0  ;;  %v690_v22 = vadd.f32 %v689_v14, %v2731_v58 }
 0x193   : > { %2073 = vst [vmem:[%s2741_s26 + $0x20] sm:$0xff] %v1853_v12   ;;  %v1933_v17 = vpack.c.bf16 %v586_v13, %v582_v5  ;;  %v691_v18 = vpop.f32.mrf.mxu1  ;;  %v590_v20 = vadd.f32 %v589_v16, %v2731_v58 }
 0x194   : > { %2098 = vst [vmem:[%s2745_s28 + $0x70] sm:$0xff] %v1983_v15   ;;  %v591_v19 = vpop.f32.mrf.mxu0  ;;  %v692_v29 = vadd.f32 %v691_v18, %v2734_v60 }
 0x195   : > { %2088 = vst [vmem:[%s2745_s28 + $0x20] sm:$0xff] %v1933_v17   ;;  %v693_v21 = vpop.f32.mrf.mxu1  ;;  %v592_v26 = vadd.f32 %v591_v19, %v2734_v60 }
 0x196   : > { %v593_v23 = vpop.f32.mrf.mxu0  ;;  %v694_v24 = vadd.f32 %v693_v21, %v2731_v58 }
 0x197   : > { %v594_v27 = vadd.f32 %v593_v23, %v2731_v58  ;;  %v695_v28 = vpop.f32.mrf.mxu1 }
 0x198   : > { %v1908_v30 = vpack.c.bf16 %v694_v24, %v690_v22  ;;  %v595_v31 = vpop.f32.mrf.mxu0  ;;  %v696_v32 = vadd.f32 %v695_v28, %v2734_v60 }
 0x199   : > { %v1858_v33 = vpack.c.bf16 %v594_v27, %v590_v20  ;;  %v596_v34 = vadd.f32 %v595_v31, %v2734_v60  ;;  %v2145_v35 = vpop.f32.mrf.mxu1 }
 0x19a   : > { %2084 = vst [vmem:[%s2741_s26 + $0x78] sm:$0xff] %v1908_v30   ;;  %v1988_v36 = vpack.c.bf16 %v696_v32, %v692_v29  ;;  %v599_v54 = vpop.f32.mrf.mxu0  ;;  %v741_v43 = vadd.f32 %v2145_v35, %v2801_v37 }
 0x19b   : > { %2074 = vst [vmem:[%s2741_s26 + $0x28] sm:$0xff] %v1858_v33   ;;  %v1938_v38 = vpack.c.bf16 %v596_v34, %v592_v26  ;;  %v732_v39 = vpop.f32.mrf.mxu1  ;;  %v600_v41 = vadd.f32 %v599_v54, %v2731_v58 }
 0x19c   : > { %2099 = vst [vmem:[%s2745_s28 + $0x78] sm:$0xff] %v1988_v36   ;;  %v601_v40 = vpop.f32.mrf.mxu0  ;;  %v733_v48 = vadd.f32 %v732_v39, %v2801_v37 }
 0x19d   : > { %2089 = vst [vmem:[%s2745_s28 + $0x28] sm:$0xff] %v1938_v38   ;;  %v2146_v42 = vpop.f32.mrf.mxu1  ;;  %v602_v46 = vadd.f32 %v601_v40, %v2734_v60 }
 0x19e   : > { %v603_v44 = vpop.f32.mrf.mxu0  ;;  %v744_v45 = vadd.f32 %v2146_v42, %v2801_v37 }
 0x19f   : > { %v604_v56 = vadd.f32 %v603_v44, %v2731_v58  ;;  %v735_v47 = vpop.f32.mrf.mxu1 }
 0x1a0   : > { %v1998_v49 = vpack.c.bf16 %v744_v45, %v741_v43  ;;  %v605_v50 = vpop.f32.mrf.mxu0  ;;  %v736_v51 = vadd.f32 %v735_v47, %v2801_v37 }
 0x1a1   : > { %v1863_v52 = vpack.c.bf16 %v604_v56, %v600_v41  ;;  %v606_v53 = vadd.f32 %v605_v50, %v2734_v60  ;;  %v2149_v55 = vpop.f32.mrf.mxu1 }
 0x1a2   : > { %2100 = vst [vmem:[%s2815_s10 + $0x8] sm:$0xff] %v1998_v49   ;;  %v1993_v57 = vpack.c.bf16 %v736_v51, %v733_v48  ;;  %v609_v59 = vpop.f32.mrf.mxu0  ;;  %v757_v2 = vadd.f32 %v2149_v55, %v2801_v37 }
 0x1a3   : > { %2075 = vst [vmem:[%s2741_s26 + $0x30] sm:$0xff] %v1863_v52   ;;  %v1943_v61 = vpack.c.bf16 %v606_v53, %v602_v46  ;;  %v748_v62 = vpop.f32.mrf.mxu1  ;;  %v610_v0 = vadd.f32 %v609_v59, %v2731_v58 }
 0x1a4   : > { %1994 = vst [vmem:[%s2815_s10] sm:$0xff] %v1993_v57   ;;  %v611_v63 = vpop.f32.mrf.mxu0  ;;  %v749_v8 = vadd.f32 %v748_v62, %v2801_v37 }
 0x1a5   : > { %2090 = vst [vmem:[%s2745_s28 + $0x30] sm:$0xff] %v1943_v61   ;;  %v2150_v1 = vpop.f32.mrf.mxu1  ;;  %v612_v5 = vadd.f32 %v611_v63, %v2734_v60 }
 0x1a6   : > { %v613_v3 = vpop.f32.mrf.mxu0  ;;  %v760_v4 = vadd.f32 %v2150_v1, %v2801_v37 }
 0x1a7   : > { %v614_v6 = vadd.f32 %v613_v3, %v2731_v58  ;;  %v751_v7 = vpop.f32.mrf.mxu1 }
 0x1a8   : > { %v2008_v9 = vpack.c.bf16 %v760_v4, %v757_v2  ;;  %v615_v10 = vpop.f32.mrf.mxu0  ;;  %v752_v11 = vadd.f32 %v751_v7, %v2801_v37 }
 0x1a9   : > { %v1868_v12 = vpack.c.bf16 %v614_v6, %v610_v0  ;;  %v616_v13 = vadd.f32 %v615_v10, %v2734_v60  ;;  %v2153_v14 = vpop.f32.mrf.mxu1 }
 0x1aa   : > { %2102 = vst [vmem:[%s2815_s10 + $0x18] sm:$0xff] %v2008_v9   ;;  %v2003_v15 = vpack.c.bf16 %v752_v11, %v749_v8  ;;  %v619_v16 = vpop.f32.mrf.mxu0  ;;  %v773_v21 = vadd.f32 %v2153_v14, %v2801_v37 }
 0x1ab   : > { %2076 = vst [vmem:[%s2741_s26 + $0x38] sm:$0xff] %v1868_v12   ;;  %v1948_v17 = vpack.c.bf16 %v616_v13, %v612_v5  ;;  %v764_v18 = vpop.f32.mrf.mxu1  ;;  %v620_v24 = vadd.f32 %v619_v16, %v2731_v58 }
 0x1ac   : > { %2101 = vst [vmem:[%s2815_s10 + $0x10] sm:$0xff] %v2003_v15   ;;  %v621_v19 = vpop.f32.mrf.mxu0  ;;  %v765_v27 = vadd.f32 %v764_v18, %v2801_v37 }
 0x1ad   : > { %2091 = vst [vmem:[%s2745_s28 + $0x38] sm:$0xff] %v1948_v17   ;;  %v2154_v20 = vpop.f32.mrf.mxu1  ;;  %v622_v31 = vadd.f32 %v621_v19, %v2734_v60 }
 0x1ae   : > { %v623_v22 = vpop.f32.mrf.mxu0  ;;  %v776_v23 = vadd.f32 %v2154_v20, %v2801_v37 }
 0x1af   : > { %v624_v25 = vadd.f32 %v623_v22, %v2731_v58  ;;  %v767_v26 = vpop.f32.mrf.mxu1 }
 0x1b0   : > { %v2018_v28 = vpack.c.bf16 %v776_v23, %v773_v21  ;;  %v625_v29 = vpop.f32.mrf.mxu0  ;;  %v768_v30 = vadd.f32 %v767_v26, %v2801_v37 }
 0x1b1   : > { %v1873_v32 = vpack.c.bf16 %v624_v25, %v620_v24  ;;  %v626_v33 = vadd.f32 %v625_v29, %v2734_v60  ;;  %v2157_v34 = vpop.f32.mrf.mxu1 }
 0x1b2   : > { %2104 = vst [vmem:[%s2815_s10 + $0x28] sm:$0xff] %v2018_v28   ;;  %v2013_v35 = vpack.c.bf16 %v768_v30, %v765_v27  ;;  %v629_v36 = vpop.f32.mrf.mxu0  ;;  %v789_v41 = vadd.f32 %v2157_v34, %v2801_v37 }
 0x1b3   : > { %2077 = vst [vmem:[%s2741_s26 + $0x40] sm:$0xff] %v1873_v32   ;;  %v1953_v54 = vpack.c.bf16 %v626_v33, %v622_v31  ;;  %v780_v38 = vpop.f32.mrf.mxu1  ;;  %v630_v44 = vadd.f32 %v629_v36, %v2731_v58 }
 0x1b4   : > { %2103 = vst [vmem:[%s2815_s10 + $0x20] sm:$0xff] %v2013_v35   ;;  %v631_v39 = vpop.f32.mrf.mxu0  ;;  %v781_v56 = vadd.f32 %v780_v38, %v2801_v37 }
 0x1b5   : > { %2092 = vst [vmem:[%s2745_s28 + $0x40] sm:$0xff] %v1953_v54   ;;  %v2158_v40 = vpop.f32.mrf.mxu1  ;;  %v632_v50 = vadd.f32 %v631_v39, %v2734_v60 }
 0x1b6   : > { %v633_v42 = vpop.f32.mrf.mxu0  ;;  %v792_v43 = vadd.f32 %v2158_v40, %v2801_v37 }
 0x1b7   : > { %v634_v45 = vadd.f32 %v633_v42, %v2731_v58  ;;  %v783_v46 = vpop.f32.mrf.mxu1 }
 0x1b8   : > { %v2028_v47 = vpack.c.bf16 %v792_v43, %v789_v41  ;;  %v635_v48 = vpop.f32.mrf.mxu0  ;;  %v784_v49 = vadd.f32 %v783_v46, %v2801_v37 }
 0x1b9   : > { %v1878_v51 = vpack.c.bf16 %v634_v45, %v630_v44  ;;  %v636_v52 = vadd.f32 %v635_v48, %v2734_v60  ;;  %v2161_v53 = vpop.f32.mrf.mxu1 }
 0x1ba   : > { %2106 = vst [vmem:[%s2815_s10 + $0x38] sm:$0xff] %v2028_v47   ;;  %v2023_v55 = vpack.c.bf16 %v784_v49, %v781_v56  ;;  %v639_v57 = vpop.f32.mrf.mxu0  ;;  %v805_v0 = vadd.f32 %v2161_v53, %v2801_v37 }
 0x1bb   : > { %2078 = vst [vmem:[%s2741_s26 + $0x48] sm:$0xff] %v1878_v51   ;;  %v1958_v59 = vpack.c.bf16 %v636_v52, %v632_v50  ;;  %v796_v61 = vpop.f32.mrf.mxu1  ;;  %v640_v3 = vadd.f32 %v639_v57, %v2731_v58 }
 0x1bc   : > { %2105 = vst [vmem:[%s2815_s10 + $0x30] sm:$0xff] %v2023_v55   ;;  %v641_v62 = vpop.f32.mrf.mxu0  ;;  %v797_v6 = vadd.f32 %v796_v61, %v2801_v37 }
 0x1bd   : > { %2093 = vst [vmem:[%s2745_s28 + $0x48] sm:$0xff] %v1958_v59   ;;  %v2162_v63 = vpop.f32.mrf.mxu1  ;;  %v642_v10 = vadd.f32 %v641_v62, %v2734_v60 }
 0x1be   : > { %v643_v1 = vpop.f32.mrf.mxu0  ;;  %v808_v2 = vadd.f32 %v2162_v63, %v2801_v37 }
 0x1bf   : > { %v644_v4 = vadd.f32 %v643_v1, %v2731_v58  ;;  %v799_v5 = vpop.f32.mrf.mxu1 }
 0x1c0   : > { %v2038_v7 = vpack.c.bf16 %v808_v2, %v805_v0  ;;  %v645_v8 = vpop.f32.mrf.mxu0  ;;  %v800_v9 = vadd.f32 %v799_v5, %v2801_v37 }
 0x1c1   : > { %v1883_v11 = vpack.c.bf16 %v644_v4, %v640_v3  ;;  %v646_v12 = vadd.f32 %v645_v8, %v2734_v60  ;;  %v2165_v13 = vpop.f32.mrf.mxu1 }
 0x1c2   : > { %2108 = vst [vmem:[%s2815_s10 + $0x48] sm:$0xff] %v2038_v7   ;;  %v2033_v14 = vpack.c.bf16 %v800_v9, %v797_v6  ;;  %v649_v15 = vpop.f32.mrf.mxu0  ;;  %v821_v20 = vadd.f32 %v2165_v13, %v2801_v37 }
 0x1c3   : > { %2079 = vst [vmem:[%s2741_s26 + $0x50] sm:$0xff] %v1883_v11   ;;  %v1963_v16 = vpack.c.bf16 %v646_v12, %v642_v10  ;;  %v812_v17 = vpop.f32.mrf.mxu1  ;;  %v650_v23 = vadd.f32 %v649_v15, %v2731_v58 }
 0x1c4   : > { %2107 = vst [vmem:[%s2815_s10 + $0x40] sm:$0xff] %v2033_v14   ;;  %v651_v18 = vpop.f32.mrf.mxu0  ;;  %v813_v26 = vadd.f32 %v812_v17, %v2801_v37 }
 0x1c5   : > { %2094 = vst [vmem:[%s2745_s28 + $0x50] sm:$0xff] %v1963_v16   ;;  %v2166_v19 = vpop.f32.mrf.mxu1  ;;  %v652_v30 = vadd.f32 %v651_v18, %v2734_v60 }
 0x1c6   : > { %v653_v21 = vpop.f32.mrf.mxu0  ;;  %v824_v22 = vadd.f32 %v2166_v19, %v2801_v37 }
 0x1c7   : > { %v654_v24 = vadd.f32 %v653_v21, %v2731_v58  ;;  %v815_v25 = vpop.f32.mrf.mxu1 }
 0x1c8   : > { %v2048_v27 = vpack.c.bf16 %v824_v22, %v821_v20  ;;  %v655_v28 = vpop.f32.mrf.mxu0  ;;  %v816_v29 = vadd.f32 %v815_v25, %v2801_v37 }
 0x1c9   : > { %v1888_v31 = vpack.c.bf16 %v654_v24, %v650_v23  ;;  %v656_v32 = vadd.f32 %v655_v28, %v2734_v60  ;;  %v2169_v33 = vpop.f32.mrf.mxu1 }
 0x1ca   : > { %2110 = vst [vmem:[%s2815_s10 + $0x58] sm:$0xff] %v2048_v27   ;;  %v2043_v58 = vpack.c.bf16 %v816_v29, %v813_v26 }
 0x1cb   : > { %2080 = vst [vmem:[%s2741_s26 + $0x58] sm:$0xff] %v1888_v31   ;;  %v1968_v34 = vpack.c.bf16 %v656_v32, %v652_v30  ;;  %v828_v35 = vpop.f32.mrf.mxu1  ;;  %s2349_s26 = scalar_lea.vmem %s2348_s13, 4096 }
 0x1cc   : > { %2109 = vst [vmem:[%s2815_s10 + $0x50] sm:$0xff] %v2043_v58   ;;  %p2351_p5 = scmp.lt.s32.totalorder %s2349_s26, %s2343_s1 }
 0x1ce   : > { %p2352_p7 = por %p2351_p5, %p2350_p3 }
 0x1d0   : > { %p2353_p2 = pnand %p2352_p7, %p2346_p12 }
 0x1d2   : > { %2356 = shalt.err (!%p2353_p2)
}
 0x1d3   : > { %s2357_s6 = scalar_lea.hbm %s2887_s14, 2048  ;;  %s2361_s25 = scalar_lea.hbm %s3030_s3, 4096 }
 0x1d4   : > { %p2358_p6 = scmp.ne.s32.totalorder %s2887_s14, %s2357_s6  ;;  %p2362_p11 = scmp.lt.s32.totalorder %s2887_s14, %s3030_s3 }
 0x1d5   : > { %p2363_p1 = scmp.lt.s32.totalorder %s2361_s25, %s2357_s6 }
 0x1d6   : > { %p2359_p9 = pnand %p2358_p6, %p2612_p0 }
 0x1d7   : > { %p2364_p8 = por %p2363_p1, %p2362_p11 }
 0x1d8   : > { %p2360_p13 = pneg %p2359_p9 }
 0x1da   : > { %p2365_p4 = pnand %p2364_p8, %p2360_p13 }
 0x1dc   : > { %2368 = shalt.err (!%p2365_p4)
}
 0x1dd   : > { %s2493_s1 = smov 64   ;;  %s2494_s13 = smov 4   ;;  %2095 = vst [vmem:[%s2745_s28 + $0x58] sm:$0xff] %v1968_v34   ;;  %v2170_v60 = vpop.f32.mrf.mxu1  ;;  %v837_v36 = vadd.f32 %v2169_v33, %v2801_v37 }
 0x1de   : > { %s3049_s11 = scalar_lea.sflag [#allocation4], %s2640_s17  ;;  %v840_v54 = vadd.f32 %v2170_v60, %v2801_v37  ;;  %s3050_s9 = sand.u32 1, %s2558_s24  }
 0x1df   : > { %2189 = dma.vmem_to_hbm [thread:$0]  (%p2612_p0), %s2889_s16, 2048, %s2887_s14, %s3049_s11, %s2493_s1, %s2493_s1, %s2494_s13  }
 0x1e0   : > { %s2933_s26 = scalar_lea.sflag [#allocation9], %s3050_s9  ;;  %s2369_s6 = scalar_lea.vmem %s2899_s21, 2048 }
 0x1e1   : > { %p2370_p10 = scmp.ne.s32.totalorder %s2899_s21, %s2369_s6  ;;  %s2495_s29 = smov [#allocation8]  }
 0x1e2   : > { %s2373_s8 = sshll.u32 %s2495_s29, 4  ;;  %s2374_s8 = int_to_ptr.vmem [resolvable:$false] %s2373_s8 }
 0x1e3   : > { %p2371_p12 = pnand %p2370_p10, %p2612_p0  ;;  %s2375_s25 = scalar_lea.vmem %s2374_s8, 4096 }
 0x1e4   : > { %p2376_p5 = scmp.lt.s32.totalorder %s2899_s21, %s2374_s8  ;;  %p2377_p7 = scmp.lt.s32.totalorder %s2375_s25, %s2369_s6 }
 0x1e5   : > { %p2372_p3 = pneg %p2371_p12 }
 0x1e6   : > { %p2378_p2 = por %p2377_p7, %p2376_p5 }
 0x1e8   : > { %p2379_p6 = pnand %p2378_p2, %p2372_p3 }
 0x1ea   : > { %2382 = shalt.err (!%p2379_p6)
}
 0x1eb   : > { %s2383_s24 = scalar_lea.hbm %s2897_s7, 2048  ;;  %s2387_s16 = scalar_lea.hbm %s3031_s4, 4096 }
 0x1ec   : > { %p2384_p9 = scmp.ne.s32.totalorder %s2897_s7, %s2383_s24  ;;  %p2388_p1 = scmp.lt.s32.totalorder %s2897_s7, %s3031_s4 }
 0x1ed   : > { %p2389_p8 = scmp.lt.s32.totalorder %s2387_s16, %s2383_s24 }
 0x1ee   : > { %p2385_p13 = pnand %p2384_p9, %p2612_p0 }
 0x1ef   : > { %p2390_p4 = por %p2389_p8, %p2388_p1 }
 0x1f0   : > { %p2386_p11 = pneg %p2385_p13 }
 0x1f2   : > { %p2391_p10 = pnand %p2390_p4, %p2386_p11 }
 0x1f4   : > { %2394 = shalt.err (!%p2391_p10)
}
 0x1f5   : > { %2190 = dma.vmem_to_hbm [thread:$0]  (%p2612_p0), %s2899_s21, 2048, %s2897_s7, %s2933_s26, %s2493_s1, %s2493_s1, %s2494_s13   ;;  %v831_v38 = vpop.f32.mrf.mxu1  ;;  %v829_v39 = vadd.f32 %v828_v35, %v2801_v37  ;;  %v2058_v40 = vpack.c.bf16 %v840_v54, %v837_v36 }
 0x1f6   : > { %v832_v41 = vadd.f32 %v831_v38, %v2801_v37  ;;  %s1401_s21 = sshll.u32 %s2815_s10, 4  ;;  %s2973_s6 = scalar_lea.hbm %s3032_s5, %s2873_s12  ;;  %s2975_s21 = int_to_ptr.vmem [resolvable:$true] %s1401_s21 }
 0x1f7   : > { %v2173_v42 = vpop.f32.mrf.mxu1  ;;  %2112 = vst [vmem:[%s2815_s10 + $0x68] sm:$0xff] %v2058_v40   ;;  %s2395_s29 = scalar_lea.vmem %s2975_s21, 2048  ;;  %s2496_s8 = smov [#allocation10]  }
 0x1f8   : > { %v2053_v43 = vpack.c.bf16 %v832_v41, %v829_v39  ;;  %v853_v46 = vadd.f32 %v2173_v42, %v2801_v37  ;;  %p2396_p12 = scmp.ne.s32.totalorder %s2975_s21, %s2395_s29  ;;  %s2399_s25 = sshll.u32 %s2496_s8, 4  ;;  %s2400_s25 = int_to_ptr.vmem [resolvable:$false] %s2399_s25 }
 0x1f9   : > { %v844_v44 = vpop.f32.mrf.mxu1  ;;  %s2401_s24 = scalar_lea.vmem %s2400_s25, 4096  ;;  %p2402_p7 = scmp.lt.s32.totalorder %s2975_s21, %s2400_s25 }
 0x1fa   : > { %2111 = vst [vmem:[%s2815_s10 + $0x60] sm:$0xff] %v2053_v43   ;;  %v845_v48 = vadd.f32 %v844_v44, %v2801_v37  ;;  %p2397_p3 = pnand %p2396_p12, %p2612_p0  ;;  %p2403_p2 = scmp.lt.s32.totalorder %s2401_s24, %s2395_s29 }
 0x1fb   : > { %v2174_v45 = vpop.f32.mrf.mxu1 }
 0x1fc   : > { %v856_v56 = vadd.f32 %v2174_v45, %v2801_v37  ;;  %p2398_p5 = pneg %p2397_p3  ;;  %p2404_p6 = por %p2403_p2, %p2402_p7 }
 0x1fd   : > { %v847_v47 = vpop.f32.mrf.mxu1 }
 0x1fe   : > { %v2068_v49 = vpack.c.bf16 %v856_v56, %v853_v46  ;;  %v848_v50 = vadd.f32 %v847_v47, %v2801_v37  ;;  %p2405_p9 = pnand %p2404_p6, %p2398_p5 }
 0x200   : > { %2114 = vst [vmem:[%s2815_s10 + $0x78] sm:$0xff] %v2068_v49   ;;  %v2063_v51 = vpack.c.bf16 %v848_v50, %v845_v48 }
 0x202   : > { %2113 = vst [vmem:[%s2815_s10 + $0x70] sm:$0xff] %v2063_v51  }
 0x203   : > { %2408 = shalt.err (!%p2405_p9)
}
 0x204   : > { %s2409_s12 = scalar_lea.hbm %s2973_s6, 2048  ;;  %s2413_s28 = scalar_lea.hbm %s3032_s5, 4096 }
 0x205   : > { %p2410_p13 = scmp.ne.s32.totalorder %s2973_s6, %s2409_s12  ;;  %p2414_p8 = scmp.lt.s32.totalorder %s2973_s6, %s3032_s5 }
 0x206   : > { %p2415_p4 = scmp.lt.s32.totalorder %s2413_s28, %s2409_s12 }
 0x207   : > { %p2411_p11 = pnand %p2410_p13, %p2612_p0 }
 0x208   : > { %p2416_p10 = por %p2415_p4, %p2414_p8 }
 0x209   : > { %p2412_p1 = pneg %p2411_p11 }
 0x20b   : > { %p2417_p12 = pnand %p2416_p10, %p2412_p1 }
 0x20d   : > { %2420 = shalt.err (!%p2417_p12)
}
 0x20e   : > { %2191 = dma.vmem_to_hbm [thread:$0]  (%p2612_p0), %s2975_s21, 2048, %s2973_s6, %s2933_s26, %s2493_s1, %s2493_s1, %s2494_s13  }
 0x20f PF: > { %s1416_s11 = sand.u32 1, %s2463_s18   ;;  %p3051_p3 = scmp.ne.s32.totalorder %s3038_s27, 0 }
 0x210   : > { %p3052_p5 = scmp.ge.s32.totalorder %s2483_s23, 2  ;;  %s1417_s7 = scalar_lea.sflag [#allocation4], %s1416_s11 }
 0x212   : > { %p2204_p7 = pnand %p3052_p5, %p3051_p3 }
 0x214   : > { %p2205_p2 = pneg %p2204_p7 }
 0x216   : > { %2454 = dma.done.wait (%p2205_p2), %s1417_s7, 2048  }
 0x217   : > { %2456 = vsyncadd (%p2205_p2), %s1417_s7, 4294965248  ;;  %s3053_s15 = sadd.s32 4294967294, %s2483_s23  }
 0x218   : > { %s1425_s9 = sand.u32 1, %s3053_s15  }
 0x219   : > { %s1426_s29 = scalar_lea.sflag [#allocation9], %s1425_s9 }
 0x21a   : > { %2458 = dma.done.wait (%p2205_p2), %s1426_s29, 4096  }
 0x21b   : > { %2460 = vsyncadd (%p2205_p2), %s1426_s29, 4294963200  ;;  %s26_s23 = sadd.s32 1, %s2483_s23   ;;  %s3054_s27 = sld [smem:[#allocation15_spill]] }
 0x21c   : > { %p23_p0 = scmp.ge.s32.totalorder %s26_s23, 4   ;;  %s3055_s18 = smov %s2467_s19 }
 0x21d   : > { %s3056_s19 = smov %s2471_s20  ;;  %s3057_s20 = smov %s2621_s30 }
 0x21e   : > { %s3058_s21 = smov %s2479_s22  ;;  %25 = sbr.rel (!%p23_p0) target bundleno = 11 (0xb), region = 113 }
 0x221   : > { %s3059_s22 = smov %s3054_s27 }
 0x223   :  { %1440 = vsyncpa [#allocation3], 1 }
 0x224   :  { %1442 = vsyncpa [#allocation3 + $0x1], 1 }
 0x225   :  { %1443 = vsyncpa [#allocation6], 1 }
 0x226   :  { %1444 = vsyncpa [#allocation4], 1 }
 0x227   :  { %1446 = vsyncpa [#allocation4 + $0x1], 1 }
 0x228   :  { %1447 = vsyncpa [#allocation9], 1 }
 0x229   :  { %1449 = vsyncpa [#allocation9 + $0x1], 1 }

</bundles_post_ra>
